<compile_context>
chip_gen: v6e
topology: v6e:2x2x1
jax: 0.10.0
libtpu: 0.0.40
codegen_flags: <defaults>
</compile_context>

<pallas_src>
import functools

import numpy as np
import jax
import jax.numpy as jnp
from jax.experimental import pallas as pl
from jax.experimental.pallas import tpu as pltpu


LOSS_CLASS = {
    'det': ['CenterMap', 'CenterMap_3D'],
    'loc': ['Cam', 'init_pj2d', 'cams_init', 'P_KP2D'],
    'reg': ['MPJPE', 'PAMPJPE', 'P_KP2D', 'Pose', 'Shape', 'Prior', 'ortho'],
}
ALL_LOSS_NAMES = [n for names in LOSS_CLASS.values() for n in names]
LOSS_THRESH = 50.0                     # stand-in for args().loss_thresh

LANES = 128
OUT_ROWS = 8
TARGET_ELEMS_PER_STEP = 32768          # per-loss elements per grid step
VMEM_PIPE_BUDGET = 20 * 1024 * 1024    # pipelined buffers budget (safe on v7x)


def _round_up(x, m):
    return ((x + m - 1) // m) * m


def _learnable_loss_kernel(*refs, n_losses, rows, n_cols, inv_n, thresh,
                           tile_cols, num_tiles, needs_mask):
    """Grid: (num_tiles,) over the column axis of the (rows, n_cols) losses.

    refs layout:
      refs[0:n_losses]   per-loss (rows, tile_cols) input blocks (sublane-dense)
      refs[n_losses]     sel_ref (n_losses*rows, 128) selector/membership matrix
                         (resident; lane l -> per-loss mean, lane n_losses+c ->
                          class c sum, last class lane = 'Others')
      refs[n_losses+1]   out_ref (8, 128) packed output (resident)
      refs[n_losses+2]   acc_ref (n_losses*rows, tile_cols) f32 scratch
    """
    loss_refs = refs[:n_losses]
    sel_ref = refs[n_losses]
    out_ref = refs[n_losses + 1]
    acc_ref = refs[n_losses + 2]

    m = pl.program_id(0)
    last = num_tiles - 1

    @pl.when(m == 0)
    def _init():
        acc_ref[...] = jnp.zeros_like(acc_ref)

    def _accumulate(masked):
        if masked:
            col = (jax.lax.broadcasted_iota(jnp.int32, (1, tile_cols), 1)
                   + m * tile_cols)
            keep = col < n_cols
        # Steady state: pure VPU adds into the persistent accumulator; hidden
        # under the HBM->VMEM DMAs of the next grid step (kernel is mem-bound).
        for l, xref in enumerate(loss_refs):
            x = xref[...].astype(jnp.float32)            # (rows, tile_cols)
            if masked:
                x = jnp.where(keep, x, 0.0)              # drop OOB garbage/NaN
            sl = pl.ds(l * rows, rows)
            acc_ref[sl, :] = acc_ref[sl, :] + x

    if needs_mask and num_tiles > 1:
        @pl.when(m < last)
        def _steady():
            _accumulate(False)

        @pl.when(m == last)
        def _edge():
            _accumulate(True)
    else:
        _accumulate(needs_mask)

    @pl.when(m == last)
    def _finalize():
        # Lane reduce: per sublane-row partial sums.
        row_sums = jnp.sum(acc_ref[...], axis=1, keepdims=True)   # (L*rows, 1)
        sel = sel_ref[...]                                        # (L*rows, 128)
        # Group rows per loss / per class with one masked sublane reduce; the
        # where() keeps a NaN mean from poisoning lanes that don't include it.
        packed = jnp.sum(jnp.where(sel > 0.5, row_sums, 0.0),
                         axis=0, keepdims=True) * inv_n           # (1, 128)
        # total: drop NaN means, clip means >= thresh down to thresh
        # (value / (value.item()/thresh) == thresh), sum over loss lanes only.
        lane = jax.lax.broadcasted_iota(jnp.int32, (1, LANES), 1)
        clipped = jnp.where(jnp.isnan(packed), 0.0,
                            jnp.minimum(packed, thresh))
        total = jnp.sum(jnp.where(lane < n_losses, clipped, 0.0))

        out_ref[...] = jnp.zeros_like(out_ref)
        out_ref[pl.ds(0, 1), :] = packed                          # means+tasks
        out_ref[pl.ds(1, 1), :] = total * jnp.ones((1, LANES), jnp.float32)


def learnable_loss_pallas(loss_blocks, sel, n_elems, thresh, tile_cols=None):
    """loss_blocks: L arrays, each (rows, n_cols), any float dtype.
    sel: (L*rows, 128) f32 selector/membership matrix.
    Returns packed (8, 128) f32: row 0 lanes [0,L) = per-loss means,
    lanes [L, L+n_class+1) = per-class sums (+Others); row 1 = total loss."""
    n_losses = len(loss_blocks)
    rows, n_cols = loss_blocks[0].shape
    assert sel.shape == (n_losses * rows, LANES)

    # VMEM-budgeted column tile: double-buffered inputs + persistent accumulator
    # must stay well under the v7x scoped limit (32 MiB of 64 MiB physical).
    per_col_bytes = sum(2 * rows * a.dtype.itemsize for a in loss_blocks) \
        + n_losses * rows * 4
    if tile_cols is None:
        cap = min(max(TARGET_ELEMS_PER_STEP // rows, 128),
                  max(VMEM_PIPE_BUDGET // per_col_bytes, 128))
        cap = max((cap // 128) * 128, 128)
        tile_cols = min(_round_up(n_cols, 128), cap)
    tile_cols = max(_round_up(int(tile_cols), 128), 128)
    num_tiles = int(pl.cdiv(n_cols, tile_cols))
    needs_mask = (n_cols % tile_cols) != 0

    kernel = functools.partial(
        _learnable_loss_kernel,
        n_losses=n_losses, rows=rows, n_cols=n_cols,
        inv_n=1.0 / float(n_elems), thresh=float(thresh),
        tile_cols=tile_cols, num_tiles=num_tiles, needs_mask=needs_mask)

    loss_specs = [pl.BlockSpec((rows, tile_cols), lambda m: (0, m))
                  for _ in range(n_losses)]
    sel_spec = pl.BlockSpec(sel.shape, lambda m: (0, 0))

    grid_spec = pltpu.PrefetchScalarGridSpec(
        num_scalar_prefetch=0,
        grid=(num_tiles,),
        in_specs=loss_specs + [sel_spec],
        out_specs=pl.BlockSpec((OUT_ROWS, LANES), lambda m: (0, 0)),
        scratch_shapes=[pltpu.VMEM((n_losses * rows, tile_cols), jnp.float32)],
    )

    in_bytes = sum(int(np.prod(a.shape)) * a.dtype.itemsize for a in loss_blocks)
    cost = pl.CostEstimate(
        flops=n_losses * n_elems + n_losses * rows * LANES,
        transcendentals=0,
        bytes_accessed=in_bytes + int(sel.size) * 4 + OUT_ROWS * LANES * 4)

    vmem_est = tile_cols * per_col_bytes + int(sel.size) * 4 \
        + OUT_ROWS * LANES * 4 + (1 << 20)
    vmem_limit = int(min(max(vmem_est + (4 << 20), 16 << 20), 30 << 20))

    out = pl.pallas_call(
        kernel,
        grid_spec=grid_spec,
        out_shape=jax.ShapeDtypeStruct((OUT_ROWS, LANES), jnp.float32),
        compiler_params=pltpu.CompilerParams(
            dimension_semantics=("arbitrary",),
            vmem_limit_bytes=vmem_limit),
        cost_estimate=cost,
    )(*loss_blocks, sel)
    return out


class LearnableLoss:
    """JAX/Pallas port of Learnable_Loss with the base config:
    learn_relative / video / dynamic_augment / learn_motion_offset3D disabled
    and model_return_loss=False, so the conditional re-compute branches
    (calc_pampjpe, _calc_world_trans_loss_) are not taken."""

    def __init__(self, ID_num=0):
        self.loss_class = LOSS_CLASS
        self.all_loss_names = ALL_LOSS_NAMES
        self.class_names = list(self.loss_class.keys())
        self._sel_cache = {}   # device-cached selector matrix per (names, rows)

    @staticmethod
    def _sublane_rows(n):
        for r in (16, 8, 4, 2, 1):
            if n % r == 0:
                return r
        return 1

    def _selector(self, names, rows):
        key = (tuple(names), rows)
        if key not in self._sel_cache:
            L = len(names)
            nclass = len(self.class_names)
            assert L + nclass + 1 <= LANES, "too many loss terms for one lane row"
            sel = np.zeros((L * rows, LANES), np.float32)
            for li, lname in enumerate(names):
                r0 = li * rows
                sel[r0:r0 + rows, li] = 1.0                     # per-loss mean
                for ci, cname in enumerate(self.class_names):
                    if lname in self.loss_class[cname]:
                        sel[r0:r0 + rows, L + ci] = 1.0         # class sum
                if lname not in self.all_loss_names:
                    sel[r0:r0 + rows, L + nclass] = 1.0         # 'Others'
            has_others = any(n not in self.all_loss_names for n in names)
            self._sel_cache[key] = (jnp.asarray(sel), has_others)
        return self._sel_cache[key]

    def forward(self, outputs, new_training=False, tile_cols=None):
        # TODO(synk): args().model_return_loss PAMPJPE (Procrustes-aligned)
        # recompute and dynamic_augment world_trans branches rely on external
        # helpers and data-dependent gathers; not ported (base config disables them).
        # TODO(synk): forward-only port; wrap learnable_loss_pallas in
        # jax.custom_vjp (grad = sel/n with thresh/mean scaling above the clip)
        # if gradients through `loss` are needed.
        loss_dict = {k: v for k, v in outputs['loss_dict'].items()
                     if not isinstance(v, int)}
        names = list(loss_dict.keys())

        flat = []
        for v in loss_dict.values():
            a = jnp.asarray(v)
            if not jnp.issubdtype(a.dtype, jnp.floating):
                a = a.astype(jnp.float32)
            flat.append(jnp.reshape(a, (-1,)))
        n_elems = int(flat[0].shape[0])
        # TODO(synk): the original supports differently-shaped loss tensors
        # (independent .mean() per term); this port assumes equal element counts.
        assert all(f.shape[0] == n_elems for f in flat), \
            "this port assumes equally-sized loss tensors"

        # Sublane-dense, metadata-only reshape: (rows, n/rows) so the steady
        # state accumulates full (8..16, 128) vregs instead of 1-sublane rows.
        rows = self._sublane_rows(n_elems)
        blocks = [jnp.reshape(f, (rows, n_elems // rows)) for f in flat]

        sel, has_others = self._selector(names, rows)

        out = learnable_loss_pallas(blocks, sel, n_elems, LOSS_THRESH,
                                    tile_cols=tile_cols)

        L = len(names)
        nclass = len(self.class_names)
        loss = out[1, 0]
        mean_loss_dict = {name: out[0, i] for i, name in enumerate(names)}
        loss_tasks = {cname: out[0, L + ci]
                      for ci, cname in enumerate(self.class_names)}
        # Host-side structural check (no device->host sync).  Differs from the
        # original only when the 'Others' sum is exactly 0.0.
        if has_others:
            loss_tasks['Others'] = out[0, L + nclass]
        outputs['loss_dict'] = dict(loss_tasks, **mean_loss_dict)
        return loss, outputs


if __name__ == "__main__":
    key = jax.random.PRNGKey(0)
    B, N = 2, 2496   # each loss term is a (B, N) per-element tensor (4992 elems)
    loss_names = ['CenterMap', 'CenterMap_3D', 'Cam', 'init_pj2d', 'cams_init',
                  'P_KP2D', 'MPJPE', 'PAMPJPE', 'Pose', 'Shape', 'Prior',
                  'ortho', 'extra_unlisted']
    bf16_names = {'Pose', 'Shape'}   # exercise mixed dtype / packed bf16 upcast
    keys = jax.random.split(key, len(loss_names))

    def make_loss_dict():
        d = {}
        for name, k in zip(loss_names, keys):
            v = jax.random.uniform(k, (B, N), jnp.float32)
            if name == 'MPJPE':
                v = v * 500.0        # mean exceeds loss_thresh -> clip path
            if name in bf16_names:
                v = v.astype(jnp.bfloat16)
            d[name] = v
        return d

    model = LearnableLoss()

    # pure-JAX reference
    ref_dict = make_loss_dict()
    ref_means = {n: jnp.mean(v.astype(jnp.float32)) for n, v in ref_dict.items()}
    ref_loss = sum(jnp.where(m < LOSS_THRESH, m, LOSS_THRESH)
                   for m in ref_means.values())

    def check(loss, outs):
        assert np.allclose(np.asarray(loss), np.asarray(ref_loss),
                           rtol=1e-5, atol=1e-5)
        for n in loss_names:
            assert np.allclose(np.asarray(outs['loss_dict'][n]),
                               np.asarray(ref_means[n]), rtol=1e-5, atol=1e-5)
        for cname, members in LOSS_CLASS.items():
            ref_task = sum(ref_means[m] for m in members if m in ref_means)
            assert np.allclose(np.asarray(outs['loss_dict'][cname]),
                               np.asarray(ref_task), rtol=1e-5, atol=1e-5)
        assert np.allclose(np.asarray(outs['loss_dict']['Others']),
                           np.asarray(ref_means['extra_unlisted']),
                           rtol=1e-5, atol=1e-5)

    # 1) auto tile selection (single grid step at this size)
    loss1, out1 = model.forward({'loss_dict': make_loss_dict()})
    loss1 = jax.block_until_ready(loss1)
    check(loss1, out1)

    # 2) forced small tile -> 3 grid steps: exercises the persistent VMEM
    #    accumulator, the unmasked interior path and the masked last tile.
    loss2, out2 = model.forward({'loss_dict': make_loss_dict()}, tile_cols=128)
    loss2 = jax.block_until_ready(loss2)
    check(loss2, out2)

    print("KERNEL_OK")
</pallas_src>

<mosaic_0001>
module attributes {stable_mosaic.version = 11 : i64} {
  func.func @_learnable_loss_kernel(%arg0: i32, %arg1: memref<16x384xf32, #tpu.memory_space<vmem>>, %arg2: memref<16x384xf32, #tpu.memory_space<vmem>>, %arg3: memref<16x384xf32, #tpu.memory_space<vmem>>, %arg4: memref<16x384xf32, #tpu.memory_space<vmem>>, %arg5: memref<16x384xf32, #tpu.memory_space<vmem>>, %arg6: memref<16x384xf32, #tpu.memory_space<vmem>>, %arg7: memref<16x384xf32, #tpu.memory_space<vmem>>, %arg8: memref<16x384xf32, #tpu.memory_space<vmem>>, %arg9: memref<16x384xbf16, #tpu.memory_space<vmem>>, %arg10: memref<16x384xbf16, #tpu.memory_space<vmem>>, %arg11: memref<16x384xf32, #tpu.memory_space<vmem>>, %arg12: memref<16x384xf32, #tpu.memory_space<vmem>>, %arg13: memref<16x384xf32, #tpu.memory_space<vmem>>, %arg14: memref<208x128xf32, #tpu.memory_space<vmem>>, %arg15: memref<8x128xf32, #tpu.memory_space<vmem>>, %arg16: memref<208x384xf32, #tpu.memory_space<vmem>>) attributes {dimension_semantics = [#tpu.dimension_semantics<arbitrary>], iteration_bounds = array<i64: 1>, scalar_prefetch = 0 : i64, scratch_operands = 1 : i64, tpu.core_type = #tpu.core_type<tc>, window_params = [{transform_indices = @transform_0, window_bounds = array<i64: 16, 384>}, {transform_indices = @transform_1, window_bounds = array<i64: 16, 384>}, {transform_indices = @transform_2, window_bounds = array<i64: 16, 384>}, {transform_indices = @transform_3, window_bounds = array<i64: 16, 384>}, {transform_indices = @transform_4, window_bounds = array<i64: 16, 384>}, {transform_indices = @transform_5, window_bounds = array<i64: 16, 384>}, {transform_indices = @transform_6, window_bounds = array<i64: 16, 384>}, {transform_indices = @transform_7, window_bounds = array<i64: 16, 384>}, {transform_indices = @transform_8, window_bounds = array<i64: 16, 384>}, {transform_indices = @transform_9, window_bounds = array<i64: 16, 384>}, {transform_indices = @transform_10, window_bounds = array<i64: 16, 384>}, {transform_indices = @transform_11, window_bounds = array<i64: 16, 384>}, {transform_indices = @transform_12, window_bounds = array<i64: 16, 384>}, {pipeline_mode = #tpu.pipeline_mode<synchronous>, transform_indices = @transform_13, window_bounds = array<i64: 208, 128>}, {pipeline_mode = #tpu.pipeline_mode<synchronous>, transform_indices = @transform_14, window_bounds = array<i64: 8, 128>}]} {
    %c0_i32 = arith.constant 0 : i32
    %0 = arith.cmpi eq, %arg0, %c0_i32 : i32
    %1 = arith.extui %0 : i1 to i32
    %c0_i32_0 = arith.constant 0 : i32
    %2 = arith.cmpi ne, %1, %c0_i32_0 : i32
    scf.if %2 {
      %cst_80 = arith.constant 0.000000e+00 : f32
      %118 = vector.broadcast %cst_80 : f32 to vector<208x384xf32>
      %c0_81 = arith.constant 0 : index
      %c0_82 = arith.constant 0 : index
      %119 = vector.load %arg16[%c0_81, %c0_82] : memref<208x384xf32, #tpu.memory_space<vmem>>, vector<208x384xf32>
      tpu.vector_store %arg16[%c0_81, %c0_82], %118 {strides = array<i32>} : memref<208x384xf32, #tpu.memory_space<vmem>>, vector<208x384xf32>,
    } else {
    }
    %3 = tpu.iota {dimensions = array<i32: 1>} : vector<1x384xi32>
    %c384_i32 = arith.constant 384 : i32
    %4 = arith.muli %arg0, %c384_i32 : i32
    %5 = vector.broadcast %4 : i32 to vector<1x384xi32>
    %6 = arith.addi %3, %5 : vector<1x384xi32>
    %c312_i32 = arith.constant 312 : i32
    %7 = vector.broadcast %c312_i32 : i32 to vector<1x384xi32>
    %8 = arith.cmpi slt, %6, %7 : vector<1x384xi32>
    %c0 = arith.constant 0 : index
    %c0_1 = arith.constant 0 : index
    %9 = vector.load %arg1[%c0, %c0_1] : memref<16x384xf32, #tpu.memory_space<vmem>>, vector<16x384xf32>
    %cst = arith.constant 0.000000e+00 : f32
    %10 = vector.shape_cast %8 : vector<1x384xi1> to vector<1x384xi1>
    %11 = vector.broadcast %10 : vector<1x384xi1> to vector<16x384xi1>
    %12 = vector.broadcast %cst : f32 to vector<16x384xf32>
    %13 = arith.select %11, %9, %12 : vector<16x384xi1>, vector<16x384xf32>
    %c0_2 = arith.constant 0 : index
    %c0_3 = arith.constant 0 : index
    %14 = vector.load %arg16[%c0_2, %c0_3] : memref<208x384xf32, #tpu.memory_space<vmem>>, vector<16x384xf32>
    %15 = arith.addf %14, %13 : vector<16x384xf32>
    %c0_4 = arith.constant 0 : index
    %c0_5 = arith.constant 0 : index
    %16 = vector.load %arg16[%c0_4, %c0_5] : memref<208x384xf32, #tpu.memory_space<vmem>>, vector<16x384xf32>
    tpu.vector_store %arg16[%c0_4, %c0_5], %15 {strides = array<i32>} : memref<208x384xf32, #tpu.memory_space<vmem>>, vector<16x384xf32>,
    %c0_6 = arith.constant 0 : index
    %c0_7 = arith.constant 0 : index
    %17 = vector.load %arg2[%c0_6, %c0_7] : memref<16x384xf32, #tpu.memory_space<vmem>>, vector<16x384xf32>
    %cst_8 = arith.constant 0.000000e+00 : f32
    %18 = vector.shape_cast %8 : vector<1x384xi1> to vector<1x384xi1>
    %19 = vector.broadcast %18 : vector<1x384xi1> to vector<16x384xi1>
    %20 = vector.broadcast %cst_8 : f32 to vector<16x384xf32>
    %21 = arith.select %19, %17, %20 : vector<16x384xi1>, vector<16x384xf32>
    %c16 = arith.constant 16 : index
    %c0_9 = arith.constant 0 : index
    %22 = vector.load %arg16[%c16, %c0_9] : memref<208x384xf32, #tpu.memory_space<vmem>>, vector<16x384xf32>
    %23 = arith.addf %22, %21 : vector<16x384xf32>
    %c16_10 = arith.constant 16 : index
    %c0_11 = arith.constant 0 : index
    %24 = vector.load %arg16[%c16_10, %c0_11] : memref<208x384xf32, #tpu.memory_space<vmem>>, vector<16x384xf32>
    tpu.vector_store %arg16[%c16_10, %c0_11], %23 {strides = array<i32>} : memref<208x384xf32, #tpu.memory_space<vmem>>, vector<16x384xf32>,
    %c0_12 = arith.constant 0 : index
    %c0_13 = arith.constant 0 : index
    %25 = vector.load %arg3[%c0_12, %c0_13] : memref<16x384xf32, #tpu.memory_space<vmem>>, vector<16x384xf32>
    %cst_14 = arith.constant 0.000000e+00 : f32
    %26 = vector.shape_cast %8 : vector<1x384xi1> to vector<1x384xi1>
    %27 = vector.broadcast %26 : vector<1x384xi1> to vector<16x384xi1>
    %28 = vector.broadcast %cst_14 : f32 to vector<16x384xf32>
    %29 = arith.select %27, %25, %28 : vector<16x384xi1>, vector<16x384xf32>
    %c32 = arith.constant 32 : index
    %c0_15 = arith.constant 0 : index
    %30 = vector.load %arg16[%c32, %c0_15] : memref<208x384xf32, #tpu.memory_space<vmem>>, vector<16x384xf32>
    %31 = arith.addf %30, %29 : vector<16x384xf32>
    %c32_16 = arith.constant 32 : index
    %c0_17 = arith.constant 0 : index
    %32 = vector.load %arg16[%c32_16, %c0_17] : memref<208x384xf32, #tpu.memory_space<vmem>>, vector<16x384xf32>
    tpu.vector_store %arg16[%c32_16, %c0_17], %31 {strides = array<i32>} : memref<208x384xf32, #tpu.memory_space<vmem>>, vector<16x384xf32>,
    %c0_18 = arith.constant 0 : index
    %c0_19 = arith.constant 0 : index
    %33 = vector.load %arg4[%c0_18, %c0_19] : memref<16x384xf32, #tpu.memory_space<vmem>>, vector<16x384xf32>
    %cst_20 = arith.constant 0.000000e+00 : f32
    %34 = vector.shape_cast %8 : vector<1x384xi1> to vector<1x384xi1>
    %35 = vector.broadcast %34 : vector<1x384xi1> to vector<16x384xi1>
    %36 = vector.broadcast %cst_20 : f32 to vector<16x384xf32>
    %37 = arith.select %35, %33, %36 : vector<16x384xi1>, vector<16x384xf32>
    %c48 = arith.constant 48 : index
    %c0_21 = arith.constant 0 : index
    %38 = vector.load %arg16[%c48, %c0_21] : memref<208x384xf32, #tpu.memory_space<vmem>>, vector<16x384xf32>
    %39 = arith.addf %38, %37 : vector<16x384xf32>
    %c48_22 = arith.constant 48 : index
    %c0_23 = arith.constant 0 : index
    %40 = vector.load %arg16[%c48_22, %c0_23] : memref<208x384xf32, #tpu.memory_space<vmem>>, vector<16x384xf32>
    tpu.vector_store %arg16[%c48_22, %c0_23], %39 {strides = array<i32>} : memref<208x384xf32, #tpu.memory_space<vmem>>, vector<16x384xf32>,
    %c0_24 = arith.constant 0 : index
    %c0_25 = arith.constant 0 : index
    %41 = vector.load %arg5[%c0_24, %c0_25] : memref<16x384xf32, #tpu.memory_space<vmem>>, vector<16x384xf32>
    %cst_26 = arith.constant 0.000000e+00 : f32
    %42 = vector.shape_cast %8 : vector<1x384xi1> to vector<1x384xi1>
    %43 = vector.broadcast %42 : vector<1x384xi1> to vector<16x384xi1>
    %44 = vector.broadcast %cst_26 : f32 to vector<16x384xf32>
    %45 = arith.select %43, %41, %44 : vector<16x384xi1>, vector<16x384xf32>
    %c64 = arith.constant 64 : index
    %c0_27 = arith.constant 0 : index
    %46 = vector.load %arg16[%c64, %c0_27] : memref<208x384xf32, #tpu.memory_space<vmem>>, vector<16x384xf32>
    %47 = arith.addf %46, %45 : vector<16x384xf32>
    %c64_28 = arith.constant 64 : index
    %c0_29 = arith.constant 0 : index
    %48 = vector.load %arg16[%c64_28, %c0_29] : memref<208x384xf32, #tpu.memory_space<vmem>>, vector<16x384xf32>
    tpu.vector_store %arg16[%c64_28, %c0_29], %47 {strides = array<i32>} : memref<208x384xf32, #tpu.memory_space<vmem>>, vector<16x384xf32>,
    %c0_30 = arith.constant 0 : index
    %c0_31 = arith.constant 0 : index
    %49 = vector.load %arg6[%c0_30, %c0_31] : memref<16x384xf32, #tpu.memory_space<vmem>>, vector<16x384xf32>
    %cst_32 = arith.constant 0.000000e+00 : f32
    %50 = vector.shape_cast %8 : vector<1x384xi1> to vector<1x384xi1>
    %51 = vector.broadcast %50 : vector<1x384xi1> to vector<16x384xi1>
    %52 = vector.broadcast %cst_32 : f32 to vector<16x384xf32>
    %53 = arith.select %51, %49, %52 : vector<16x384xi1>, vector<16x384xf32>
    %c80 = arith.constant 80 : index
    %c0_33 = arith.constant 0 : index
    %54 = vector.load %arg16[%c80, %c0_33] : memref<208x384xf32, #tpu.memory_space<vmem>>, vector<16x384xf32>
    %55 = arith.addf %54, %53 : vector<16x384xf32>
    %c80_34 = arith.constant 80 : index
    %c0_35 = arith.constant 0 : index
    %56 = vector.load %arg16[%c80_34, %c0_35] : memref<208x384xf32, #tpu.memory_space<vmem>>, vector<16x384xf32>
    tpu.vector_store %arg16[%c80_34, %c0_35], %55 {strides = array<i32>} : memref<208x384xf32, #tpu.memory_space<vmem>>, vector<16x384xf32>,
    %c0_36 = arith.constant 0 : index
    %c0_37 = arith.constant 0 : index
    %57 = vector.load %arg7[%c0_36, %c0_37] : memref<16x384xf32, #tpu.memory_space<vmem>>, vector<16x384xf32>
    %cst_38 = arith.constant 0.000000e+00 : f32
    %58 = vector.shape_cast %8 : vector<1x384xi1> to vector<1x384xi1>
    %59 = vector.broadcast %58 : vector<1x384xi1> to vector<16x384xi1>
    %60 = vector.broadcast %cst_38 : f32 to vector<16x384xf32>
    %61 = arith.select %59, %57, %60 : vector<16x384xi1>, vector<16x384xf32>
    %c96 = arith.constant 96 : index
    %c0_39 = arith.constant 0 : index
    %62 = vector.load %arg16[%c96, %c0_39] : memref<208x384xf32, #tpu.memory_space<vmem>>, vector<16x384xf32>
    %63 = arith.addf %62, %61 : vector<16x384xf32>
    %c96_40 = arith.constant 96 : index
    %c0_41 = arith.constant 0 : index
    %64 = vector.load %arg16[%c96_40, %c0_41] : memref<208x384xf32, #tpu.memory_space<vmem>>, vector<16x384xf32>
    tpu.vector_store %arg16[%c96_40, %c0_41], %63 {strides = array<i32>} : memref<208x384xf32, #tpu.memory_space<vmem>>, vector<16x384xf32>,
    %c0_42 = arith.constant 0 : index
    %c0_43 = arith.constant 0 : index
    %65 = vector.load %arg8[%c0_42, %c0_43] : memref<16x384xf32, #tpu.memory_space<vmem>>, vector<16x384xf32>
    %cst_44 = arith.constant 0.000000e+00 : f32
    %66 = vector.shape_cast %8 : vector<1x384xi1> to vector<1x384xi1>
    %67 = vector.broadcast %66 : vector<1x384xi1> to vector<16x384xi1>
    %68 = vector.broadcast %cst_44 : f32 to vector<16x384xf32>
    %69 = arith.select %67, %65, %68 : vector<16x384xi1>, vector<16x384xf32>
    %c112 = arith.constant 112 : index
    %c0_45 = arith.constant 0 : index
    %70 = vector.load %arg16[%c112, %c0_45] : memref<208x384xf32, #tpu.memory_space<vmem>>, vector<16x384xf32>
    %71 = arith.addf %70, %69 : vector<16x384xf32>
    %c112_46 = arith.constant 112 : index
    %c0_47 = arith.constant 0 : index
    %72 = vector.load %arg16[%c112_46, %c0_47] : memref<208x384xf32, #tpu.memory_space<vmem>>, vector<16x384xf32>
    tpu.vector_store %arg16[%c112_46, %c0_47], %71 {strides = array<i32>} : memref<208x384xf32, #tpu.memory_space<vmem>>, vector<16x384xf32>,
    %c0_48 = arith.constant 0 : index
    %c0_49 = arith.constant 0 : index
    %73 = vector.load %arg9[%c0_48, %c0_49] : memref<16x384xbf16, #tpu.memory_space<vmem>>, vector<16x384xbf16>
    %74 = arith.extf %73 : vector<16x384xbf16> to vector<16x384xf32>
    %cst_50 = arith.constant 0.000000e+00 : f32
    %75 = vector.shape_cast %8 : vector<1x384xi1> to vector<1x384xi1>
    %76 = vector.broadcast %75 : vector<1x384xi1> to vector<16x384xi1>
    %77 = vector.broadcast %cst_50 : f32 to vector<16x384xf32>
    %78 = arith.select %76, %74, %77 : vector<16x384xi1>, vector<16x384xf32>
    %c128 = arith.constant 128 : index
    %c0_51 = arith.constant 0 : index
    %79 = vector.load %arg16[%c128, %c0_51] : memref<208x384xf32, #tpu.memory_space<vmem>>, vector<16x384xf32>
    %80 = arith.addf %79, %78 : vector<16x384xf32>
    %c128_52 = arith.constant 128 : index
    %c0_53 = arith.constant 0 : index
    %81 = vector.load %arg16[%c128_52, %c0_53] : memref<208x384xf32, #tpu.memory_space<vmem>>, vector<16x384xf32>
    tpu.vector_store %arg16[%c128_52, %c0_53], %80 {strides = array<i32>} : memref<208x384xf32, #tpu.memory_space<vmem>>, vector<16x384xf32>,
    %c0_54 = arith.constant 0 : index
    %c0_55 = arith.constant 0 : index
    %82 = vector.load %arg10[%c0_54, %c0_55] : memref<16x384xbf16, #tpu.memory_space<vmem>>, vector<16x384xbf16>
    %83 = arith.extf %82 : vector<16x384xbf16> to vector<16x384xf32>
    %cst_56 = arith.constant 0.000000e+00 : f32
    %84 = vector.shape_cast %8 : vector<1x384xi1> to vector<1x384xi1>
    %85 = vector.broadcast %84 : vector<1x384xi1> to vector<16x384xi1>
    %86 = vector.broadcast %cst_56 : f32 to vector<16x384xf32>
    %87 = arith.select %85, %83, %86 : vector<16x384xi1>, vector<16x384xf32>
    %c144 = arith.constant 144 : index
    %c0_57 = arith.constant 0 : index
    %88 = vector.load %arg16[%c144, %c0_57] : memref<208x384xf32, #tpu.memory_space<vmem>>, vector<16x384xf32>
    %89 = arith.addf %88, %87 : vector<16x384xf32>
    %c144_58 = arith.constant 144 : index
    %c0_59 = arith.constant 0 : index
    %90 = vector.load %arg16[%c144_58, %c0_59] : memref<208x384xf32, #tpu.memory_space<vmem>>, vector<16x384xf32>
    tpu.vector_store %arg16[%c144_58, %c0_59], %89 {strides = array<i32>} : memref<208x384xf32, #tpu.memory_space<vmem>>, vector<16x384xf32>,
    %c0_60 = arith.constant 0 : index
    %c0_61 = arith.constant 0 : index
    %91 = vector.load %arg11[%c0_60, %c0_61] : memref<16x384xf32, #tpu.memory_space<vmem>>, vector<16x384xf32>
    %cst_62 = arith.constant 0.000000e+00 : f32
    %92 = vector.shape_cast %8 : vector<1x384xi1> to vector<1x384xi1>
    %93 = vector.broadcast %92 : vector<1x384xi1> to vector<16x384xi1>
    %94 = vector.broadcast %cst_62 : f32 to vector<16x384xf32>
    %95 = arith.select %93, %91, %94 : vector<16x384xi1>, vector<16x384xf32>
    %c160 = arith.constant 160 : index
    %c0_63 = arith.constant 0 : index
    %96 = vector.load %arg16[%c160, %c0_63] : memref<208x384xf32, #tpu.memory_space<vmem>>, vector<16x384xf32>
    %97 = arith.addf %96, %95 : vector<16x384xf32>
    %c160_64 = arith.constant 160 : index
    %c0_65 = arith.constant 0 : index
    %98 = vector.load %arg16[%c160_64, %c0_65] : memref<208x384xf32, #tpu.memory_space<vmem>>, vector<16x384xf32>
    tpu.vector_store %arg16[%c160_64, %c0_65], %97 {strides = array<i32>} : memref<208x384xf32, #tpu.memory_space<vmem>>, vector<16x384xf32>,
    %c0_66 = arith.constant 0 : index
    %c0_67 = arith.constant 0 : index
    %99 = vector.load %arg12[%c0_66, %c0_67] : memref<16x384xf32, #tpu.memory_space<vmem>>, vector<16x384xf32>
    %cst_68 = arith.constant 0.000000e+00 : f32
    %100 = vector.shape_cast %8 : vector<1x384xi1> to vector<1x384xi1>
    %101 = vector.broadcast %100 : vector<1x384xi1> to vector<16x384xi1>
    %102 = vector.broadcast %cst_68 : f32 to vector<16x384xf32>
    %103 = arith.select %101, %99, %102 : vector<16x384xi1>, vector<16x384xf32>
    %c176 = arith.constant 176 : index
    %c0_69 = arith.constant 0 : index
    %104 = vector.load %arg16[%c176, %c0_69] : memref<208x384xf32, #tpu.memory_space<vmem>>, vector<16x384xf32>
    %105 = arith.addf %104, %103 : vector<16x384xf32>
    %c176_70 = arith.constant 176 : index
    %c0_71 = arith.constant 0 : index
    %106 = vector.load %arg16[%c176_70, %c0_71] : memref<208x384xf32, #tpu.memory_space<vmem>>, vector<16x384xf32>
    tpu.vector_store %arg16[%c176_70, %c0_71], %105 {strides = array<i32>} : memref<208x384xf32, #tpu.memory_space<vmem>>, vector<16x384xf32>,
    %c0_72 = arith.constant 0 : index
    %c0_73 = arith.constant 0 : index
    %107 = vector.load %arg13[%c0_72, %c0_73] : memref<16x384xf32, #tpu.memory_space<vmem>>, vector<16x384xf32>
    %cst_74 = arith.constant 0.000000e+00 : f32
    %108 = vector.shape_cast %8 : vector<1x384xi1> to vector<1x384xi1>
    %109 = vector.broadcast %108 : vector<1x384xi1> to vector<16x384xi1>
    %110 = vector.broadcast %cst_74 : f32 to vector<16x384xf32>
    %111 = arith.select %109, %107, %110 : vector<16x384xi1>, vector<16x384xf32>
    %c192 = arith.constant 192 : index
    %c0_75 = arith.constant 0 : index
    %112 = vector.load %arg16[%c192, %c0_75] : memref<208x384xf32, #tpu.memory_space<vmem>>, vector<16x384xf32>
    %113 = arith.addf %112, %111 : vector<16x384xf32>
    %c192_76 = arith.constant 192 : index
    %c0_77 = arith.constant 0 : index
    %114 = vector.load %arg16[%c192_76, %c0_77] : memref<208x384xf32, #tpu.memory_space<vmem>>, vector<16x384xf32>
    tpu.vector_store %arg16[%c192_76, %c0_77], %113 {strides = array<i32>} : memref<208x384xf32, #tpu.memory_space<vmem>>, vector<16x384xf32>,
    %c0_i32_78 = arith.constant 0 : i32
    %115 = arith.cmpi eq, %arg0, %c0_i32_78 : i32
    %116 = arith.extui %115 : i1 to i32
    %c0_i32_79 = arith.constant 0 : i32
    %117 = arith.cmpi ne, %116, %c0_i32_79 : i32
    scf.if %117 {
      %c0_80 = arith.constant 0 : index
      %c0_81 = arith.constant 0 : index
      %118 = vector.load %arg16[%c0_80, %c0_81] : memref<208x384xf32, #tpu.memory_space<vmem>>, vector<208x384xf32>
      %cst_82 = arith.constant dense<0.000000e+00> : vector<208xf32>
      %119 = vector.multi_reduction <add>, %118, %cst_82 [1] : vector<208x384xf32> to vector<208xf32>
      %120 = vector.shape_cast %119 : vector<208xf32> to vector<208x1xf32>
      %c0_83 = arith.constant 0 : index
      %c0_84 = arith.constant 0 : index
      %121 = vector.load %arg14[%c0_83, %c0_84] : memref<208x128xf32, #tpu.memory_space<vmem>>, vector<208x128xf32>
      %cst_85 = arith.constant 5.000000e-01 : f32
      %122 = vector.broadcast %cst_85 : f32 to vector<208x128xf32>
      %123 = arith.cmpf ogt, %121, %122 : vector<208x128xf32>
      %cst_86 = arith.constant 0.000000e+00 : f32
      %124 = vector.shape_cast %120 : vector<208x1xf32> to vector<208x1xf32>
      %125 = vector.broadcast %124 : vector<208x1xf32> to vector<208x128xf32>
      %126 = vector.broadcast %cst_86 : f32 to vector<208x128xf32>
      %127 = arith.select %123, %125, %126 : vector<208x128xi1>, vector<208x128xf32>
      %cst_87 = arith.constant dense<0.000000e+00> : vector<128xf32>
      %128 = vector.multi_reduction <add>, %127, %cst_87 [0] : vector<208x128xf32> to vector<128xf32>
      %129 = vector.shape_cast %128 : vector<128xf32> to vector<1x128xf32>
      %cst_88 = arith.constant 2.00320515E-4 : f32
      %130 = vector.broadcast %cst_88 : f32 to vector<1x128xf32>
      %131 = arith.mulf %129, %130 : vector<1x128xf32>
      %132 = tpu.iota {dimensions = array<i32: 1>} : vector<1x128xi32>
      %133 = arith.cmpf one, %131, %131 : vector<1x128xf32>
      %cst_89 = arith.constant 5.000000e+01 : f32
      %134 = vector.broadcast %cst_89 : f32 to vector<1x128xf32>
      %135 = arith.minimumf %131, %134 : vector<1x128xf32>
      %cst_90 = arith.constant 0.000000e+00 : f32
      %136 = vector.broadcast %cst_90 : f32 to vector<1x128xf32>
      %137 = arith.select %133, %136, %135 : vector<1x128xi1>, vector<1x128xf32>
      %c13_i32 = arith.constant 13 : i32
      %138 = vector.broadcast %c13_i32 : i32 to vector<1x128xi32>
      %139 = arith.cmpi slt, %132, %138 : vector<1x128xi32>
      %cst_91 = arith.constant 0.000000e+00 : f32
      %140 = vector.broadcast %cst_91 : f32 to vector<1x128xf32>
      %141 = arith.select %139, %137, %140 : vector<1x128xi1>, vector<1x128xf32>
      %142 = vector.shape_cast %141 : vector<1x128xf32> to vector<1x1x128xf32>
      %cst_92 = arith.constant dense<0.000000e+00> : vector<1xf32>
      %143 = vector.multi_reduction <add>, %142, %cst_92 [1, 2] : vector<1x1x128xf32> to vector<1xf32>
      %144 = vector.shape_cast %143 : vector<1xf32> to vector<1x1x1xf32>
      %145 = vector.extract %144[0, 0, 0] : f32 from vector<1x1x1xf32>
      %cst_93 = arith.constant 0.000000e+00 : f32
      %146 = vector.broadcast %cst_93 : f32 to vector<8x128xf32>
      %c0_94 = arith.constant 0 : index
      %c0_95 = arith.constant 0 : index
      %147 = vector.load %arg15[%c0_94, %c0_95] : memref<8x128xf32, #tpu.memory_space<vmem>>, vector<8x128xf32>
      tpu.vector_store %arg15[%c0_94, %c0_95], %146 {strides = array<i32>} : memref<8x128xf32, #tpu.memory_space<vmem>>, vector<8x128xf32>,
      %c0_96 = arith.constant 0 : index
      %c0_97 = arith.constant 0 : index
      %148 = vector.load %arg15[%c0_96, %c0_97] : memref<8x128xf32, #tpu.memory_space<vmem>>, vector<1x128xf32>
      tpu.vector_store %arg15[%c0_96, %c0_97], %131 {strides = array<i32>} : memref<8x128xf32, #tpu.memory_space<vmem>>, vector<1x128xf32>,
      %cst_98 = arith.constant 1.000000e+00 : f32
      %149 = vector.broadcast %cst_98 : f32 to vector<1x128xf32>
      %150 = vector.broadcast %145 : f32 to vector<1x128xf32>
      %151 = arith.mulf %150, %149 : vector<1x128xf32>
      %c1 = arith.constant 1 : index
      %c0_99 = arith.constant 0 : index
      %152 = vector.load %arg15[%c1, %c0_99] : memref<8x128xf32, #tpu.memory_space<vmem>>, vector<1x128xf32>
      tpu.vector_store %arg15[%c1, %c0_99], %151 {strides = array<i32>} : memref<8x128xf32, #tpu.memory_space<vmem>>, vector<1x128xf32>,
    } else {
    }
    return
  }
  func.func @transform_0(%arg0: i32) -> (i32, i32) {
    %c0_i32 = arith.constant 0 : i32
    %c0_i32_0 = arith.constant 0 : i32
    return %c0_i32, %arg0 : i32, i32
  }
  func.func @transform_1(%arg0: i32) -> (i32, i32) {
    %c0_i32 = arith.constant 0 : i32
    %c0_i32_0 = arith.constant 0 : i32
    return %c0_i32, %arg0 : i32, i32
  }
  func.func @transform_2(%arg0: i32) -> (i32, i32) {
    %c0_i32 = arith.constant 0 : i32
    %c0_i32_0 = arith.constant 0 : i32
    return %c0_i32, %arg0 : i32, i32
  }
  func.func @transform_3(%arg0: i32) -> (i32, i32) {
    %c0_i32 = arith.constant 0 : i32
    %c0_i32_0 = arith.constant 0 : i32
    return %c0_i32, %arg0 : i32, i32
  }
  func.func @transform_4(%arg0: i32) -> (i32, i32) {
    %c0_i32 = arith.constant 0 : i32
    %c0_i32_0 = arith.constant 0 : i32
    return %c0_i32, %arg0 : i32, i32
  }
  func.func @transform_5(%arg0: i32) -> (i32, i32) {
    %c0_i32 = arith.constant 0 : i32
    %c0_i32_0 = arith.constant 0 : i32
    return %c0_i32, %arg0 : i32, i32
  }
  func.func @transform_6(%arg0: i32) -> (i32, i32) {
    %c0_i32 = arith.constant 0 : i32
    %c0_i32_0 = arith.constant 0 : i32
    return %c0_i32, %arg0 : i32, i32
  }
  func.func @transform_7(%arg0: i32) -> (i32, i32) {
    %c0_i32 = arith.constant 0 : i32
    %c0_i32_0 = arith.constant 0 : i32
    return %c0_i32, %arg0 : i32, i32
  }
  func.func @transform_8(%arg0: i32) -> (i32, i32) {
    %c0_i32 = arith.constant 0 : i32
    %c0_i32_0 = arith.constant 0 : i32
    return %c0_i32, %arg0 : i32, i32
  }
  func.func @transform_9(%arg0: i32) -> (i32, i32) {
    %c0_i32 = arith.constant 0 : i32
    %c0_i32_0 = arith.constant 0 : i32
    return %c0_i32, %arg0 : i32, i32
  }
  func.func @transform_10(%arg0: i32) -> (i32, i32) {
    %c0_i32 = arith.constant 0 : i32
    %c0_i32_0 = arith.constant 0 : i32
    return %c0_i32, %arg0 : i32, i32
  }
  func.func @transform_11(%arg0: i32) -> (i32, i32) {
    %c0_i32 = arith.constant 0 : i32
    %c0_i32_0 = arith.constant 0 : i32
    return %c0_i32, %arg0 : i32, i32
  }
  func.func @transform_12(%arg0: i32) -> (i32, i32) {
    %c0_i32 = arith.constant 0 : i32
    %c0_i32_0 = arith.constant 0 : i32
    return %c0_i32, %arg0 : i32, i32
  }
  func.func @transform_13(%arg0: i32) -> (i32, i32) {
    %c0_i32 = arith.constant 0 : i32
    %c0_i32_0 = arith.constant 0 : i32
    %c0_i32_1 = arith.constant 0 : i32
    return %c0_i32, %c0_i32_0 : i32, i32
  }
  func.func @transform_14(%arg0: i32) -> (i32, i32) {
    %c0_i32 = arith.constant 0 : i32
    %c0_i32_0 = arith.constant 0 : i32
    %c0_i32_1 = arith.constant 0 : i32
    return %c0_i32, %c0_i32_0 : i32, i32
  }
}

</mosaic_0001>

<bundles_post_ra>
// kernel: tpu_custom_call.1
= control target key start
LH: loop header
LB: loop body
LE: loop exit
PB: predicated region body
PF: predicated region fallthrough
CT: control target
= control target key end

     0   :  { %19 = vsyncpa [#allocation4], 0  ;;  %s1655_s0 = inlined_call_operand.hbm [shape: f32[16,312], index: 0, kind: input, shape index: {}]   ;;  %s1656_s1 = inlined_call_operand.hbm [shape: f32[16,312], index: 1, kind: input, shape index: {}]   ;;  %s1657_s2 = inlined_call_operand.hbm [shape: f32[16,312], index: 2, kind: input, shape index: {}]   ;;  %s1658_s3 = inlined_call_operand.hbm [shape: f32[16,312], index: 3, kind: input, shape index: {}]   ;;  %s1659_s4 = inlined_call_operand.hbm [shape: f32[16,312], index: 4, kind: input, shape index: {}]   ;;  %s1660_s5 = inlined_call_operand.hbm [shape: f32[16,312], index: 5, kind: input, shape index: {}]   ;;  %s1661_s6 = inlined_call_operand.hbm [shape: f32[16,312], index: 6, kind: input, shape index: {}]   ;;  %s1662_s7 = inlined_call_operand.hbm [shape: f32[16,312], index: 7, kind: input, shape index: {}]   ;;  %s1663_s8 = inlined_call_operand.hbm [shape: bf16[16,312], index: 8, kind: input, shape index: {}]   ;;  %s1664_s9 = inlined_call_operand.hbm [shape: bf16[16,312], index: 9, kind: input, shape index: {}]   ;;  %s1665_s10 = inlined_call_operand.hbm [shape: f32[16,312], index: 10, kind: input, shape index: {}]   ;;  %s1666_s11 = inlined_call_operand.hbm [shape: f32[16,312], index: 11, kind: input, shape index: {}]   ;;  %s1667_s12 = inlined_call_operand.hbm [shape: f32[16,312], index: 12, kind: input, shape index: {}]   ;;  %s1668_s13 = inlined_call_operand.hbm [shape: f32[208,128], index: 13, kind: input, shape index: {}]   ;;  %s1669_s14 = inlined_call_operand.hbm [shape: f32[8,128], index: 14, kind: output, shape index: {}]  }
   0x1   :  { %20 = vsyncpa [#allocation7], 0 }
   0x2   :  { %21 = vsyncpa [#allocation10], 0 }
   0x3   :  { %22 = vsyncpa [#allocation13], 0 }
   0x4   :  { %23 = vsyncpa [#allocation16], 0 }
   0x5   :  { %24 = vsyncpa [#allocation19], 0 }
   0x6   :  { %25 = vsyncpa [#allocation22], 0 }
   0x7   :  { %26 = vsyncpa [#allocation25], 0 }
   0x8   :  { %27 = vsyncpa [#allocation5], 0  ;;  %s1415_s29 = smov [#allocation6]   ;;  %s1416_s15 = smov [#allocation9]  }
   0x9   :  { %s45_s30 = sshll.u32 %s1415_s29, 4  ;;  %s69_s16 = sshll.u32 %s1416_s15, 4  ;;  %s46_s30 = int_to_ptr.vmem [resolvable:$true] %s45_s30  ;;  %s70_s16 = int_to_ptr.vmem [resolvable:$true] %s69_s16 }
   0xa   :  { %s1105_s17 = scalar_lea.vmem %s46_s30, 768  ;;  %p1110_p1 = scmp.lt.s32.totalorder %s46_s30, %s46_s30 }
   0xb   :  { %p1106_p0 = scmp.ne.s32.totalorder %s46_s30, %s1105_s17  ;;  %p1111_p2 = scmp.lt.s32.totalorder %s1105_s17, %s1105_s17 }
   0xd   :  { %p1112_p3 = por %p1111_p2, %p1110_p1 }
   0xf   :  { %p1113_p4 = pnand %p1112_p3, %p1106_p0 }
  0x11   :  { %1116 = shalt.err (!%p1113_p4)
}
  0x12   :  { %s1417_s18 = smov 384   ;;  %s1418_s19 = smov 24  }
  0x13   :  { %51 = dma.hbm_to_vmem [thread:$0]  %s1656_s1, 768, %s46_s30, [#allocation7], %s1417_s18, %s1417_s18, %s1418_s19  }
  0x14   :  { %s1125_s22 = scalar_lea.vmem %s70_s16, 768  ;;  %p1130_p6 = scmp.lt.s32.totalorder %s70_s16, %s70_s16 }
  0x15   :  { %p1126_p5 = scmp.ne.s32.totalorder %s70_s16, %s1125_s22  ;;  %p1131_p7 = scmp.lt.s32.totalorder %s1125_s22, %s1125_s22 }
  0x17   :  { %p1132_p8 = por %p1131_p7, %p1130_p6 }
  0x19   :  { %p1133_p9 = pnand %p1132_p8, %p1126_p5 }
  0x1b   :  { %1136 = shalt.err (!%p1133_p9)
}
  0x1c   :  { %75 = dma.hbm_to_vmem [thread:$0]  %s1658_s3, 768, %s70_s16, [#allocation10], %s1417_s18, %s1417_s18, %s1418_s19  }
  0x1d   :  { %s1419_s25 = smov [#allocation12]   ;;  %s1420_s27 = smov [#allocation15]  }
  0x1e   :  { %s93_s26 = sshll.u32 %s1419_s25, 4  ;;  %s117_s28 = sshll.u32 %s1420_s27, 4  ;;  %s94_s26 = int_to_ptr.vmem [resolvable:$true] %s93_s26  ;;  %s118_s28 = int_to_ptr.vmem [resolvable:$true] %s117_s28 }
  0x1f   :  { %s1145_s1 = scalar_lea.vmem %s94_s26, 768  ;;  %p1150_p11 = scmp.lt.s32.totalorder %s94_s26, %s94_s26 }
  0x20   :  { %p1146_p10 = scmp.ne.s32.totalorder %s94_s26, %s1145_s1  ;;  %p1151_p12 = scmp.lt.s32.totalorder %s1145_s1, %s1145_s1 }
  0x22   :  { %p1152_p13 = por %p1151_p12, %p1150_p11 }
  0x24   :  { %p1153_p0 = pnand %p1152_p13, %p1146_p10 }
  0x26   :  { %1156 = shalt.err (!%p1153_p0)
}
  0x27   :  { %99 = dma.hbm_to_vmem [thread:$0]  %s1660_s5, 768, %s94_s26, [#allocation13], %s1417_s18, %s1417_s18, %s1418_s19  }
  0x28   :  { %s1165_s3 = scalar_lea.vmem %s118_s28, 768  ;;  %p1170_p2 = scmp.lt.s32.totalorder %s118_s28, %s118_s28 }
  0x29   :  { %p1166_p1 = scmp.ne.s32.totalorder %s118_s28, %s1165_s3  ;;  %p1171_p3 = scmp.lt.s32.totalorder %s1165_s3, %s1165_s3 }
  0x2b   :  { %p1172_p4 = por %p1171_p3, %p1170_p2 }
  0x2d   :  { %p1173_p5 = pnand %p1172_p4, %p1166_p1 }
  0x2f   :  { %1176 = shalt.err (!%p1173_p5)
}
  0x30   :  { %123 = dma.hbm_to_vmem [thread:$0]  %s1662_s7, 768, %s118_s28, [#allocation16], %s1417_s18, %s1417_s18, %s1418_s19  }
  0x31   :  { %s1421_s17 = smov [#allocation18]   ;;  %s1422_s21 = smov [#allocation21]  }
  0x32   :  { %s141_s20 = sshll.u32 %s1421_s17, 4  ;;  %s165_s22 = sshll.u32 %s1422_s21, 4  ;;  %s142_s20 = int_to_ptr.vmem [resolvable:$true] %s141_s20  ;;  %s166_s22 = int_to_ptr.vmem [resolvable:$true] %s165_s22 }
  0x33   :  { %s1185_s5 = scalar_lea.vmem %s142_s20, 384  ;;  %p1190_p7 = scmp.lt.s32.totalorder %s142_s20, %s142_s20 }
  0x34   :  { %p1186_p6 = scmp.ne.s32.totalorder %s142_s20, %s1185_s5  ;;  %p1191_p8 = scmp.lt.s32.totalorder %s1185_s5, %s1185_s5 }
  0x36   :  { %p1192_p9 = por %p1191_p8, %p1190_p7 }
  0x38   :  { %p1193_p10 = pnand %p1192_p9, %p1186_p6 }
  0x3a   :  { %1196 = shalt.err (!%p1193_p10)
}
  0x3b   :  { %s1423_s23 = smov 192   ;;  %s1424_s24 = smov 12  }
  0x3c   :  { %147 = dma.hbm_to_vmem [thread:$0]  %s1664_s9, 384, %s142_s20, [#allocation19], %s1423_s23, %s1423_s23, %s1424_s24  }
  0x3d   :  { %s1205_s26 = scalar_lea.vmem %s166_s22, 768  ;;  %p1210_p12 = scmp.lt.s32.totalorder %s166_s22, %s166_s22 }
  0x3e   :  { %p1206_p11 = scmp.ne.s32.totalorder %s166_s22, %s1205_s26  ;;  %p1211_p13 = scmp.lt.s32.totalorder %s1205_s26, %s1205_s26 }
  0x40   :  { %p1212_p0 = por %p1211_p13, %p1210_p12 }
  0x42   :  { %p1213_p1 = pnand %p1212_p0, %p1206_p11 }
  0x44   :  { %1216 = shalt.err (!%p1213_p1)
}
  0x45   :  { %171 = dma.hbm_to_vmem [thread:$0]  %s1666_s11, 768, %s166_s22, [#allocation22], %s1417_s18, %s1417_s18, %s1418_s19  }
  0x46   :  { %s1425_s1 = smov [#allocation3]   ;;  %s1426_s30 = smov [#allocation8]  }
  0x47   :  { %s33_s29 = sshll.u32 %s1425_s1, 4  ;;  %s57_s3 = sshll.u32 %s1426_s30, 4  ;;  %s34_s29 = int_to_ptr.vmem [resolvable:$true] %s33_s29  ;;  %s58_s3 = int_to_ptr.vmem [resolvable:$true] %s57_s3 }
  0x48   :  { %s1225_s9 = scalar_lea.vmem %s34_s29, 768  ;;  %p1230_p3 = scmp.lt.s32.totalorder %s34_s29, %s34_s29 }
  0x49   :  { %p1226_p2 = scmp.ne.s32.totalorder %s34_s29, %s1225_s9  ;;  %p1231_p4 = scmp.lt.s32.totalorder %s1225_s9, %s1225_s9 }
  0x4b   :  { %p1232_p5 = por %p1231_p4, %p1230_p3 }
  0x4d   :  { %p1233_p6 = pnand %p1232_p5, %p1226_p2 }
  0x4f   :  { %1236 = shalt.err (!%p1233_p6)
}
  0x50   :  { %39 = dma.hbm_to_vmem [thread:$0]  %s1655_s0, 768, %s34_s29, [#allocation4], %s1417_s18, %s1417_s18, %s1418_s19  }
  0x51   :  { %s1245_s11 = scalar_lea.vmem %s58_s3, 768  ;;  %p1250_p8 = scmp.lt.s32.totalorder %s58_s3, %s58_s3 }
  0x52   :  { %p1246_p7 = scmp.ne.s32.totalorder %s58_s3, %s1245_s11  ;;  %p1251_p9 = scmp.lt.s32.totalorder %s1245_s11, %s1245_s11 }
  0x54   :  { %p1252_p10 = por %p1251_p9, %p1250_p8 }
  0x56   :  { %p1253_p11 = pnand %p1252_p10, %p1246_p7 }
  0x58   :  { %1256 = shalt.err (!%p1253_p11)
}
  0x59   :  { %63 = dma.hbm_to_vmem [thread:$0]  %s1657_s2, 768, %s58_s3, [#allocation7], %s1417_s18, %s1417_s18, %s1418_s19  }
  0x5a   :  { %s1427_s21 = smov [#allocation11]   ;;  %s1428_s5 = smov [#allocation14]  }
  0x5b   :  { %s81_s22 = sshll.u32 %s1427_s21, 4  ;;  %s105_s25 = sshll.u32 %s1428_s5, 4  ;;  %s82_s22 = int_to_ptr.vmem [resolvable:$true] %s81_s22  ;;  %s106_s25 = int_to_ptr.vmem [resolvable:$true] %s105_s25 }
  0x5c   :  { %s1265_s0 = scalar_lea.vmem %s82_s22, 768  ;;  %p1270_p13 = scmp.lt.s32.totalorder %s82_s22, %s82_s22 }
  0x5d   :  { %p1266_p12 = scmp.ne.s32.totalorder %s82_s22, %s1265_s0  ;;  %p1271_p0 = scmp.lt.s32.totalorder %s1265_s0, %s1265_s0 }
  0x5f   :  { %p1272_p1 = por %p1271_p0, %p1270_p13 }
  0x61   :  { %p1273_p2 = pnand %p1272_p1, %p1266_p12 }
  0x63   :  { %1276 = shalt.err (!%p1273_p2)
}
  0x64   :  { %87 = dma.hbm_to_vmem [thread:$0]  %s1659_s4, 768, %s82_s22, [#allocation10], %s1417_s18, %s1417_s18, %s1418_s19  }
  0x65   :  { %s1285_s2 = scalar_lea.vmem %s106_s25, 768  ;;  %p1290_p4 = scmp.lt.s32.totalorder %s106_s25, %s106_s25 }
  0x66   :  { %p1286_p3 = scmp.ne.s32.totalorder %s106_s25, %s1285_s2  ;;  %p1291_p5 = scmp.lt.s32.totalorder %s1285_s2, %s1285_s2 }
  0x68   :  { %p1292_p6 = por %p1291_p5, %p1290_p4 }
  0x6a   :  { %p1293_p7 = pnand %p1292_p6, %p1286_p3 }
  0x6c   :  { %1296 = shalt.err (!%p1293_p7)
}
  0x6d   :  { %111 = dma.hbm_to_vmem [thread:$0]  %s1661_s6, 768, %s106_s25, [#allocation13], %s1417_s18, %s1417_s18, %s1418_s19  }
  0x6e   :  { %s1429_s1 = smov [#allocation17]   ;;  %s1430_s30 = smov [#allocation20]  }
  0x6f   :  { %s129_s29 = sshll.u32 %s1429_s1, 4  ;;  %s153_s3 = sshll.u32 %s1430_s30, 4  ;;  %s130_s29 = int_to_ptr.vmem [resolvable:$true] %s129_s29  ;;  %s154_s3 = int_to_ptr.vmem [resolvable:$true] %s153_s3 }
  0x70   :  { %s1305_s4 = scalar_lea.vmem %s130_s29, 384  ;;  %p1310_p9 = scmp.lt.s32.totalorder %s130_s29, %s130_s29 }
  0x71   :  { %p1306_p8 = scmp.ne.s32.totalorder %s130_s29, %s1305_s4  ;;  %p1311_p10 = scmp.lt.s32.totalorder %s1305_s4, %s1305_s4 }
  0x73   :  { %p1312_p11 = por %p1311_p10, %p1310_p9 }
  0x75   :  { %p1313_p12 = pnand %p1312_p11, %p1306_p8 }
  0x77   :  { %1316 = shalt.err (!%p1313_p12)
}
  0x78   :  { %135 = dma.hbm_to_vmem [thread:$0]  %s1663_s8, 384, %s130_s29, [#allocation16], %s1423_s23, %s1423_s23, %s1424_s24  }
  0x79   :  { %s1325_s6 = scalar_lea.vmem %s154_s3, 768  ;;  %p1330_p0 = scmp.lt.s32.totalorder %s154_s3, %s154_s3 }
  0x7a   :  { %p1326_p13 = scmp.ne.s32.totalorder %s154_s3, %s1325_s6  ;;  %p1331_p1 = scmp.lt.s32.totalorder %s1325_s6, %s1325_s6 }
  0x7c   :  { %p1332_p2 = por %p1331_p1, %p1330_p0 }
  0x7e   :  { %p1333_p3 = pnand %p1332_p2, %p1326_p13 }
  0x80   :  { %1336 = shalt.err (!%p1333_p3)
}
  0x81   :  { %159 = dma.hbm_to_vmem [thread:$0]  %s1665_s10, 768, %s154_s3, [#allocation19], %s1417_s18, %s1417_s18, %s1418_s19  }
  0x82   :  { %s1431_s17 = smov [#allocation23]   ;;  %s1432_s21 = smov [#allocation24]  }
  0x83   :  { %s177_s20 = sshll.u32 %s1431_s17, 4  ;;  %s189_s22 = sshll.u32 %s1432_s21, 4  ;;  %s178_s20 = int_to_ptr.vmem [resolvable:$true] %s177_s20  ;;  %s190_s22 = int_to_ptr.vmem [resolvable:$true] %s189_s22 }
  0x84   :  { %s1345_s8 = scalar_lea.vmem %s178_s20, 768  ;;  %p1350_p5 = scmp.lt.s32.totalorder %s178_s20, %s178_s20 }
  0x85   :  { %p1346_p4 = scmp.ne.s32.totalorder %s178_s20, %s1345_s8  ;;  %p1351_p6 = scmp.lt.s32.totalorder %s1345_s8, %s1345_s8 }
  0x87   :  { %p1352_p7 = por %p1351_p6, %p1350_p5 }
  0x89   :  { %p1353_p8 = pnand %p1352_p7, %p1346_p4 }
  0x8b   :  { %1356 = shalt.err (!%p1353_p8)
}
  0x8c   :  { %183 = dma.hbm_to_vmem [thread:$0]  %s1667_s12, 768, %s178_s20, [#allocation22], %s1417_s18, %s1417_s18, %s1418_s19  }
  0x8d   :  { %s1365_s10 = scalar_lea.vmem %s190_s22, 3328  ;;  %p1370_p10 = scmp.lt.s32.totalorder %s190_s22, %s190_s22 }
  0x8e   :  { %p1366_p9 = scmp.ne.s32.totalorder %s190_s22, %s1365_s10  ;;  %p1371_p11 = scmp.lt.s32.totalorder %s1365_s10, %s1365_s10 }
  0x90   :  { %p1372_p12 = por %p1371_p11, %p1370_p10 }
  0x92   :  { %p1373_p13 = pnand %p1372_p12, %p1366_p9 }
  0x94   :  { %1376 = shalt.err (!%p1373_p13)
}
  0x95   :  { %s1433_s5 = smov 128   ;;  %s1434_s25 = smov 8  }
  0x96   :  { %195 = dma.hbm_to_vmem [thread:$0]  %s1668_s13, 3328, %s190_s22, [#allocation25], %s1433_s5, %s1433_s5, %s1434_s25  }
  0x97   :  { %1397 = dma.done.wait [#allocation4], 768  }
  0x98   :  { %1398 = vsyncadd [#allocation4], 4294966528 }
  0x99   :  { %1399 = dma.done.wait [#allocation7], 1536  }
  0x9a   :  { %1400 = vsyncadd [#allocation7], 4294965760 }
  0x9b   :  { %1401 = dma.done.wait [#allocation10], 1536  }
  0x9c   :  { %1402 = vsyncadd [#allocation10], 4294965760 }
  0x9d   :  { %1403 = dma.done.wait [#allocation13], 1536  }
  0x9e   :  { %1404 = vsyncadd [#allocation13], 4294965760 }
  0x9f   :  { %1405 = dma.done.wait [#allocation16], 1152  }
  0xa0   :  { %1406 = vsyncadd [#allocation16], 4294966144 }
  0xa1   :  { %1407 = dma.done.wait [#allocation19], 1152  }
  0xa2   :  { %1408 = vsyncadd [#allocation19], 4294966144 }
  0xa3   :  { %1409 = dma.done.wait [#allocation22], 1536  }
  0xa4   :  { %1410 = vsyncadd [#allocation22], 4294965760 }
  0xa5   :  { %1411 = dma.done.wait [#allocation25], 3328  }
  0xa6   :  { %1412 = vsyncadd [#allocation25], 4294963968  ;;  %v320_v0 = vlaneseq  ;;  %v332_v3 = vld [vmem:[#allocation3] sm:$0xff]  ;;  %v333_v4 = vld [vmem:[#allocation3 + $0x8] sm:$0xff]  ;;  %s1436_s12 = smov [#allocation26]  }
  0xa7   :  { %v334_v5 = vld [vmem:[#allocation3 + $0x10] sm:$0xff]  ;;  %v817_v7 = vadd.f32 %v333_v4, %v332_v3  ;;  %v369_v9 = vld [vmem:[#allocation6 + $0x8] sm:$0xff]  ;;  %v370_v10 = vld [vmem:[#allocation6 + $0x10] sm:$0xff]  ;;  %s1057_s13 = sshll.u32 %s1436_s12, 4  ;;  %s1058_s13 = int_to_ptr.vmem [resolvable:$true] %s1057_s13 }
  0xa8   :  { %v1593_v1 = vand.u32 127, %v320_v0  ;;  %v368_v8 = vld [vmem:[#allocation6] sm:$0xff]  ;;  %v335_v13 = vld [vmem:[#allocation3 + $0x18] sm:$0xff]  ;;  %v336_v14 = vld [vmem:[#allocation3 + $0x20] sm:$0xff]  ;;  %s1377_s19 = scalar_lea.vmem %s1058_s13, 128  ;;  %p1382_p1 = scmp.lt.s32.totalorder %s1058_s13, %s1058_s13 }
  0xa9   :  { %v825_v12 = vadd.f32 %v369_v9, %v368_v8  ;;  %v337_v15 = vld [vmem:[#allocation3 + $0x28] sm:$0xff]  ;;  %v821_v18 = vadd.f32 %v336_v14, %v335_v13  ;;  %v372_v20 = vld [vmem:[#allocation6 + $0x20] sm:$0xff]  ;;  %v373_v21 = vld [vmem:[#allocation6 + $0x28] sm:$0xff]  ;;  %p1378_p0 = scmp.ne.s32.totalorder %s1058_s13, %s1377_s19  ;;  %p1383_p2 = scmp.lt.s32.totalorder %s1377_s19, %s1377_s19 }
  0xaa   :  { %v1596_v2 = vadd.s32 256, %v1593_v1  ;;  %v371_v19 = vld [vmem:[#allocation6 + $0x18] sm:$0xff]  ;;  %v398_v25 = vld [vmem:[#allocation8] sm:$0xff]  ;;  %v400_v27 = vld [vmem:[#allocation8 + $0x10] sm:$0xff] }
  0xab   :  { %v829_v24 = vadd.f32 %v372_v20, %v371_v19  ;;  %v399_v26 = vld [vmem:[#allocation8 + $0x8] sm:$0xff]  ;;  %v401_v30 = vld [vmem:[#allocation8 + $0x18] sm:$0xff]  ;;  %v402_v31 = vld [vmem:[#allocation8 + $0x20] sm:$0xff]  ;;  %p1384_p3 = por %p1383_p2, %p1382_p1 }
  0xac   :  { %vm331_vm0 = vcmp.lt.s32.totalorder %v1596_v2, 312  ;;  %v833_v29 = vadd.f32 %v399_v26, %v398_v25  ;;  %v403_v32 = vld [vmem:[#allocation8 + $0x28] sm:$0xff]  ;;  %v837_v35 = vadd.f32 %v402_v31, %v401_v30  ;;  %v428_v36 = vld [vmem:[#allocation9] sm:$0xff]  ;;  %v429_v37 = vld [vmem:[#allocation9 + $0x8] sm:$0xff] }
  0xad   :  { %v346_v6 = vsel %vm331_vm0, %v334_v5, 0.0  ;;  %v376_v11 = vsel %vm331_vm0, %v370_v10, 0.0  ;;  %v349_v17 = vsel %vm331_vm0, %v337_v15, 0.0  ;;  %v379_v23 = vsel %vm331_vm0, %v373_v21, 0.0  ;;  %v430_v39 = vld [vmem:[#allocation9 + $0x10] sm:$0xff]  ;;  %v431_v40 = vld [vmem:[#allocation9 + $0x18] sm:$0xff]  ;;  %p1385_p4 = pnand %p1384_p3, %p1378_p0 }
  0xae   :  { %v818_v16 = vadd.f32 %v817_v7, %v346_v6  ;;  %v826_v22 = vadd.f32 %v825_v12, %v376_v11  ;;  %v822_v28 = vadd.f32 %v821_v18, %v349_v17  ;;  %v830_v33 = vadd.f32 %v829_v24, %v379_v23  ;;  %v432_v41 = vld [vmem:[#allocation9 + $0x20] sm:$0xff]  ;;  %v433_v42 = vld [vmem:[#allocation9 + $0x28] sm:$0xff]  ;;  %v458_v48 = vld [vmem:[#allocation11] sm:$0xff] }
  0xaf   :  { %v406_v34 = vsel %vm331_vm0, %v400_v27, 0.0  ;;  %v409_v38 = vsel %vm331_vm0, %v403_v32, 0.0  ;;  %v841_v44 = vadd.f32 %v429_v37, %v428_v36  ;;  %v436_v46 = vsel %vm331_vm0, %v430_v39, 0.0  ;;  %v459_v49 = vld [vmem:[#allocation11 + $0x8] sm:$0xff]  ;;  %v460_v51 = vld [vmem:[#allocation11 + $0x10] sm:$0xff]  ;;  %v461_v52 = vld [vmem:[#allocation11 + $0x18] sm:$0xff] }
  0xb0   :  { %819 = vadd.xlane.f32.xlu0 %v818_v16  ;;  %827 = vadd.xlane.f32.xlu1 %v826_v22  ;;  %v834_v43 = vadd.f32 %v833_v29, %v406_v34  ;;  %v838_v45 = vadd.f32 %v837_v35, %v409_v38  ;;  %v845_v47 = vadd.f32 %v432_v41, %v431_v40  ;;  %v439_v50 = vsel %vm331_vm0, %v433_v42, 0.0  ;;  %v462_v53 = vld [vmem:[#allocation11 + $0x20] sm:$0xff]  ;;  %v463_v54 = vld [vmem:[#allocation11 + $0x28] sm:$0xff]  ;;  %v488_v60 = vld [vmem:[#allocation12] sm:$0xff] }
  0xb1   :  { %v842_v55 = vadd.f32 %v841_v44, %v436_v46  ;;  %v849_v56 = vadd.f32 %v459_v49, %v458_v48  ;;  %v466_v58 = vsel %vm331_vm0, %v460_v51, 0.0  ;;  %v853_v59 = vadd.f32 %v462_v53, %v461_v52  ;;  %v489_v61 = vld [vmem:[#allocation12 + $0x8] sm:$0xff]  ;;  %v490_v63 = vld [vmem:[#allocation12 + $0x10] sm:$0xff]  ;;  %v491_v0 = vld [vmem:[#allocation12 + $0x18] sm:$0xff] }
  0xb2   :  { %v846_v57 = vadd.f32 %v845_v47, %v439_v50  ;;  %v469_v62 = vsel %vm331_vm0, %v463_v54, 0.0  ;;  %v492_v3 = vld [vmem:[#allocation12 + $0x20] sm:$0xff]  ;;  %v493_v4 = vld [vmem:[#allocation12 + $0x28] sm:$0xff]  ;;  %v857_v6 = vadd.f32 %v489_v61, %v488_v60  ;;  %v518_v7 = vld [vmem:[#allocation14] sm:$0xff]  ;;  %v496_v10 = vsel %vm331_vm0, %v490_v63, 0.0 }
  0xb3   :  { %v850_v5 = vadd.f32 %v849_v56, %v466_v58  ;;  %v519_v8 = vld [vmem:[#allocation14 + $0x8] sm:$0xff]  ;;  %v854_v9 = vadd.f32 %v853_v59, %v469_v62  ;;  %v861_v11 = vadd.f32 %v492_v3, %v491_v0  ;;  %v520_v12 = vld [vmem:[#allocation14 + $0x10] sm:$0xff]  ;;  %v499_v13 = vsel %vm331_vm0, %v493_v4, 0.0  ;;  %v521_v14 = vld [vmem:[#allocation14 + $0x18] sm:$0xff] }
  0xb4   :  { %823 = vadd.xlane.f32.xlu0 %v822_v28  ;;  %831 = vadd.xlane.f32.xlu1 %v830_v33  ;;  %v522_v15 = vld [vmem:[#allocation14 + $0x20] sm:$0xff]  ;;  %v865_v16 = vadd.f32 %v519_v8, %v518_v7  ;;  %v523_v17 = vld [vmem:[#allocation14 + $0x28] sm:$0xff]  ;;  %v548_v18 = vld [vmem:[#allocation15] sm:$0xff]  ;;  %v858_v20 = vadd.f32 %v857_v6, %v496_v10  ;;  %v526_v21 = vsel %vm331_vm0, %v520_v12, 0.0 }
  0xb5   :  { %v549_v19 = vld [vmem:[#allocation15 + $0x8] sm:$0xff]  ;;  %v550_v22 = vld [vmem:[#allocation15 + $0x10] sm:$0xff]  ;;  %v551_v23 = vld [vmem:[#allocation15 + $0x18] sm:$0xff]  ;;  %v862_v25 = vadd.f32 %v861_v11, %v499_v13  ;;  %v869_v26 = vadd.f32 %v522_v15, %v521_v14  ;;  %v529_v30 = vsel %vm331_vm0, %v523_v17, 0.0 }
  0xb6   :  { %v552_v24 = vld [vmem:[#allocation15 + $0x20] sm:$0xff]  ;;  %v553_v27 = vld [vmem:[#allocation15 + $0x28] sm:$0xff]  ;;  %v578_v28 = vld [vmem:[#allocation17] sm:$0xff]  ;;  %v866_v32 = vadd.f32 %v865_v16, %v526_v21  ;;  %v556_v33 = vsel %vm331_vm0, %v550_v22, 0.0  ;;  %v873_v34 = vadd.f32 %v549_v19, %v548_v18 }
  0xb7   :  { %v579_v29 = vld [vmem:[#allocation17 + $0x8] ss:$12 sps:$4 sm:$0xff]   ;;  %v580_v31 = vld [vmem:[#allocation17 + $0xc] sm:$0xff]  ;;  %v877_v35 = vadd.f32 %v552_v24, %v551_v23  ;;  %v559_v36 = vsel %vm331_vm0, %v553_v27, 0.0  ;;  %v582_v37 = vunpack.c.l.bf16 %v578_v28  ;;  %v583_v38 = vunpack.c.h.bf16 %v578_v28  ;;  %v647_v3 = vld [vmem:[#allocation20 + $0x8] sm:$0xff] }
  0xb8   :  { %835 = vadd.xlane.f32.xlu0 %v834_v43  ;;  %839 = vadd.xlane.f32.xlu1 %v838_v45  ;;  %v584_v39 = vunpack.c.l.bf16 %v579_v29  ;;  %v870_v40 = vadd.f32 %v869_v26, %v529_v30  ;;  %v585_v41 = vunpack.c.l.bf16 %v580_v31  ;;  %v586_v42 = vunpack.c.h.bf16 %v580_v31  ;;  %v612_v43 = vld [vmem:[#allocation18] sm:$0xff]  ;;  %v613_v45 = vld [vmem:[#allocation18 + $0x8] ss:$12 sps:$4 sm:$0xff]   ;;  %v614_v46 = vld [vmem:[#allocation18 + $0xc] sm:$0xff] }
  0xb9   :  { %v587_v44 = vunpack.c.h.bf16 %v579_v29  ;;  %v874_v47 = vadd.f32 %v873_v34, %v556_v33  ;;  %v878_v48 = vadd.f32 %v877_v35, %v559_v36  ;;  %v881_v50 = vadd.f32 %v583_v38, %v582_v37  ;;  %v646_v0 = vld [vmem:[#allocation20] sm:$0xff]  ;;  %v649_v6 = vld [vmem:[#allocation20 + $0x18] sm:$0xff]  ;;  %v651_v8 = vld [vmem:[#allocation20 + $0x28] sm:$0xff] }
  0xba   :  { %v590_v49 = vsel %vm331_vm0, %v584_v39, 0.0  ;;  %v616_v51 = vunpack.c.l.bf16 %v612_v43  ;;  %v617_v52 = vunpack.c.h.bf16 %v612_v43  ;;  %v885_v53 = vadd.f32 %v586_v42, %v585_v41  ;;  %v650_v7 = vld [vmem:[#allocation20 + $0x20] sm:$0xff]  ;;  %v676_v14 = vld [vmem:[#allocation21] sm:$0xff]  ;;  %v677_v15 = vld [vmem:[#allocation21 + $0x8] sm:$0xff] }
  0xbb   :  { %v618_v54 = vunpack.c.l.bf16 %v613_v45  ;;  %v620_v56 = vunpack.c.h.bf16 %v614_v46  ;;  %v621_v58 = vunpack.c.h.bf16 %v613_v45  ;;  %v882_v59 = vadd.f32 %v881_v50, %v590_v49  ;;  %v678_v17 = vld [vmem:[#allocation21 + $0x10] sm:$0xff]  ;;  %v679_v18 = vld [vmem:[#allocation21 + $0x18] sm:$0xff]  ;;  %v680_v19 = vld [vmem:[#allocation21 + $0x20] sm:$0xff] }
  0xbc   :  { %843 = vadd.xlane.f32.xlu0 %v842_v55  ;;  %847 = vadd.xlane.f32.xlu1 %v846_v57  ;;  %v619_v55 = vunpack.c.l.bf16 %v614_v46  ;;  %v593_v57 = vsel %vm331_vm0, %v587_v44, 0.0  ;;  %v889_v60 = vadd.f32 %v617_v52, %v616_v51  ;;  %v897_v10 = vadd.f32 %v647_v3, %v646_v0  ;;  %v706_v26 = vld [vmem:[#allocation23] sm:$0xff]  ;;  %v707_v27 = vld [vmem:[#allocation23 + $0x8] sm:$0xff]  ;;  %v708_v29 = vld [vmem:[#allocation23 + $0x10] sm:$0xff] }
  0xbd   :  { %v886_v61 = vadd.f32 %v885_v53, %v593_v57  ;;  %v624_v62 = vsel %vm331_vm0, %v618_v54, 0.0  ;;  %v627_v4 = vsel %vm331_vm0, %v621_v58, 0.0  ;;  %v901_v13 = vadd.f32 %v650_v7, %v649_v6  ;;  %v709_v30 = vld [vmem:[#allocation23 + $0x18] sm:$0xff]  ;;  %v710_v31 = vld [vmem:[#allocation23 + $0x20] sm:$0xff]  ;;  %v921_v42 = vld [vmem:[#allocation24] sm:$0xff] }
  0xbe   :  { %v893_v63 = vadd.f32 %v620_v56, %v619_v55  ;;  %v657_v16 = vsel %vm331_vm0, %v651_v8, 0.0  ;;  %v905_v22 = vadd.f32 %v677_v15, %v676_v14  ;;  %v684_v24 = vsel %vm331_vm0, %v678_v17, 0.0  ;;  %v922_v43 = vld [vmem:[#allocation24 + $0x8] sm:$0xff]  ;;  %v923_v45 = vld [vmem:[#allocation24 + $0x10] sm:$0xff]  ;;  %v929_v0 = vld [vmem:[#allocation24 + $0x40] sm:$0xff] }
  0xbf   :  { %v902_v23 = vadd.f32 %v901_v13, %v657_v16  ;;  %v913_v34 = vadd.f32 %v707_v27, %v706_v26  ;;  %v714_v36 = vsel %vm331_vm0, %v708_v29, 0.0  ;;  %v917_v37 = vadd.f32 %v710_v31, %v709_v30  ;;  %v926_v52 = vld [vmem:[#allocation24 + $0x28] sm:$0xff]  ;;  %v927_v56 = vld [vmem:[#allocation24 + $0x30] sm:$0xff]  ;;  %v932_v15 = vld [vmem:[#allocation24 + $0x58] sm:$0xff] }
  0xc0   :  { %851 = vadd.xlane.f32.xlu0 %v850_v5  ;;  %855 = vadd.xlane.f32.xlu1 %v854_v9  ;;  %v648_v5 = vld [vmem:[#allocation20 + $0x10] sm:$0xff]  ;;  %v890_v9 = vadd.f32 %v889_v60, %v624_v62  ;;  %v894_v11 = vadd.f32 %v893_v63, %v627_v4  ;;  %v906_v33 = vadd.f32 %v905_v22, %v684_v24  ;;  %v1435_v41 = vmov 0.0   ;;  %v930_v7 = vld [vmem:[#allocation24 + $0x48] sm:$0xff]  ;;  %v935_v26 = vld [vmem:[#allocation24 + $0x70] sm:$0xff] }
  0xc1   :  { %v654_v12 = vsel %vm331_vm0, %v648_v5, 0.0  ;;  %v914_v39 = vadd.f32 %v913_v34, %v714_v36  ;;  %1047 = vst [vmem:[#allocation26] sm:$0xff] %v1435_v41  ;;  %vm947_vm1 = vcmp.gt.f32.partialorder %v921_v42, 0.5  ;;  %vm948_vm2 = vcmp.gt.f32.partialorder %v922_v43, 0.5  ;;  %v936_v31 = vld [vmem:[#allocation24 + $0x78] sm:$0xff]  ;;  %v937_v34 = vld [vmem:[#allocation24 + $0x80] sm:$0xff] }
  0xc2   :  { %v898_v21 = vadd.f32 %v897_v10, %v654_v12  ;;  %vm949_vm3 = vcmp.gt.f32.partialorder %v923_v45, 0.5  ;;  %vm952_vm6 = vcmp.gt.f32.partialorder %v926_v52, 0.5  ;;  %vm953_vm7 = vcmp.gt.f32.partialorder %v927_v56, 0.5  ;;  %v931_v10 = vld [vmem:[#allocation24 + $0x50] sm:$0xff] }
  0xc3   :  { %vm955_vm9 = vcmp.gt.f32.partialorder %v929_v0, 0.5  ;;  %vm956_vm10 = vcmp.gt.f32.partialorder %v930_v7, 0.5  ;;  %vm957_vm11 = vcmp.gt.f32.partialorder %v931_v10, 0.5  ;;  %vm958_vm12 = vcmp.gt.f32.partialorder %v932_v15, 0.5  ;;  %v939_v42 = vld [vmem:[#allocation24 + $0x90] sm:$0xff] }
  0xc4   :  { %859 = vadd.xlane.f32.xlu0 %v858_v20  ;;  %863 = vadd.xlane.f32.xlu1 %v862_v25  ;;  %v681_v20 = vld [vmem:[#allocation21 + $0x28] sm:$0xff]  ;;  %v909_v25 = vadd.f32 %v680_v19, %v679_v18  ;;  %v933_v18 = vld [vmem:[#allocation24 + $0x60] sm:$0xff]  ;;  %vm961_vm15 = vcmp.gt.f32.partialorder %v935_v26, 0.5 }
  0xc5   :  { %v687_v28 = vsel %vm331_vm0, %v681_v20, 0.0  ;;  %vm959_vm13 = vcmp.gt.f32.partialorder %v933_v18, 0.5 }
  0xc6   :  { %v910_v35 = vadd.f32 %v909_v25, %v687_v28 }
  0xc8   :  { %867 = vadd.xlane.f32.xlu0 %v866_v32  ;;  %871 = vadd.xlane.f32.xlu1 %v870_v40  ;;  %v711_v32 = vld [vmem:[#allocation23 + $0x28] sm:$0xff] }
  0xc9   :  { %v717_v38 = vsel %vm331_vm0, %v711_v32, 0.0  ;;  %vm962_vm0 = vcmp.gt.f32.partialorder %v936_v31, 0.5 }
  0xca   :  { %v918_v40 = vadd.f32 %v917_v37, %v717_v38 }
  0xcc   :  { %875 = vadd.xlane.f32.xlu0 %v874_v47  ;;  %879 = vadd.xlane.f32.xlu1 %v878_v48  ;;  %v924_v47 = vld [vmem:[#allocation24 + $0x18] sm:$0xff]  ;;  %v925_v48 = vld [vmem:[#allocation24 + $0x20] sm:$0xff] }
  0xcd   :  { %vm950_vm4 = vcmp.gt.f32.partialorder %v924_v47, 0.5  ;;  %vm951_vm5 = vcmp.gt.f32.partialorder %v925_v48, 0.5  ;;  %v940_v47 = vld [vmem:[#allocation24 + $0x98] sm:$0xff] }
  0xd0   :  { %883 = vadd.xlane.f32.xlu0 %v882_v59  ;;  %887 = vadd.xlane.f32.xlu1 %v886_v61  ;;  %v928_v61 = vld [vmem:[#allocation24 + $0x38] sm:$0xff] }
  0xd1   :  { %vm954_vm8 = vcmp.gt.f32.partialorder %v928_v61, 0.5 }
  0xd4   :  { %891 = vadd.xlane.f32.xlu0 %v890_v9  ;;  %895 = vadd.xlane.f32.xlu1 %v894_v11 }
  0xd8   :  { %899 = vadd.xlane.f32.xlu0 %v898_v21  ;;  %903 = vadd.xlane.f32.xlu1 %v902_v23  ;;  %v934_v23 = vld [vmem:[#allocation24 + $0x68] sm:$0xff] }
  0xd9   :  { %vm960_vm14 = vcmp.gt.f32.partialorder %v934_v23, 0.5 }
  0xdc   :  { %907 = vadd.xlane.f32.xlu0 %v906_v33  ;;  %911 = vadd.xlane.f32.xlu1 %v910_v35 }
  0xe0   :  { %915 = vadd.xlane.f32.xlu0 %v914_v39  ;;  %919 = vadd.xlane.f32.xlu1 %v918_v40  ;;  %v938_v39 = vld [vmem:[#allocation24 + $0x88] sm:$0xff] }
 0x139   :  { %v820_v44 = vpop.xlane.xlu0 %819  ;;  %v828_v46 = vpop.xlane.xlu1 %827 }
 0x13a   :  { %v973_v49 = vsel %vm947_vm1, %v820_v44, 0.0  ;;  %v975_v54 = vsel %vm949_vm3, %v828_v46, 0.0  ;;  %vm963_vm1 = vcmp.gt.f32.partialorder %v937_v34, 0.5  ;;  %vm965_vm3 = vcmp.gt.f32.partialorder %v939_v42, 0.5 }
 0x13d   :  { %v824_v2 = vpop.xlane.xlu0 %823  ;;  %v832_v51 = vpop.xlane.xlu1 %831 }
 0x13e   :  { %v974_v50 = vsel %vm948_vm2, %v824_v2, 0.0  ;;  %v976_v55 = vsel %vm950_vm4, %v832_v51, 0.0  ;;  %vm964_vm2 = vcmp.gt.f32.partialorder %v938_v39, 0.5  ;;  %vm966_vm4 = vcmp.gt.f32.partialorder %v940_v47, 0.5 }
 0x13f   :  { %v999_v53 = vadd.f32 %v974_v50, %v973_v49  ;;  %v941_v49 = vld [vmem:[#allocation24 + $0xa0] sm:$0xff] }
 0x141   :  { %v1000_v57 = vadd.f32 %v999_v53, %v975_v54  ;;  %v836_v58 = vpop.xlane.xlu0 %835  ;;  %v840_v60 = vpop.xlane.xlu1 %839  ;;  %v942_v54 = vld [vmem:[#allocation24 + $0xa8] sm:$0xff] }
 0x142   :  { %v977_v59 = vsel %vm951_vm5, %v836_v58, 0.0  ;;  %v978_v63 = vsel %vm952_vm6, %v840_v60, 0.0  ;;  %vm967_vm5 = vcmp.gt.f32.partialorder %v941_v49, 0.5  ;;  %vm968_vm6 = vcmp.gt.f32.partialorder %v942_v54, 0.5 }
 0x143   :  { %v1001_v62 = vadd.f32 %v1000_v57, %v976_v55  ;;  %v943_v57 = vld [vmem:[#allocation24 + $0xb0] sm:$0xff] }
 0x145   :  { %v1002_v3 = vadd.f32 %v1001_v62, %v977_v59  ;;  %v844_v4 = vpop.xlane.xlu0 %843  ;;  %v848_v6 = vpop.xlane.xlu1 %847  ;;  %v944_v62 = vld [vmem:[#allocation24 + $0xb8] sm:$0xff] }
 0x146   :  { %v979_v5 = vsel %vm953_vm7, %v844_v4, 0.0  ;;  %v980_v9 = vsel %vm954_vm8, %v848_v6, 0.0  ;;  %vm969_vm7 = vcmp.gt.f32.partialorder %v943_v57, 0.5  ;;  %vm970_vm8 = vcmp.gt.f32.partialorder %v944_v62, 0.5 }
 0x147   :  { %v1003_v8 = vadd.f32 %v1002_v3, %v978_v63  ;;  %v945_v3 = vld [vmem:[#allocation24 + $0xc0] sm:$0xff] }
 0x149   :  { %v1004_v11 = vadd.f32 %v1003_v8, %v979_v5  ;;  %v852_v12 = vpop.xlane.xlu0 %851  ;;  %v856_v14 = vpop.xlane.xlu1 %855  ;;  %v946_v8 = vld [vmem:[#allocation24 + $0xc8] sm:$0xff] }
 0x14a   :  { %v981_v13 = vsel %vm955_vm9, %v852_v12, 0.0  ;;  %v982_v17 = vsel %vm956_vm10, %v856_v14, 0.0  ;;  %vm971_vm9 = vcmp.gt.f32.partialorder %v945_v3, 0.5  ;;  %vm972_vm10 = vcmp.gt.f32.partialorder %v946_v8, 0.5 }
 0x14b   :  { %v1005_v16 = vadd.f32 %v1004_v11, %v980_v9 }
 0x14d   :  { %v1006_v19 = vadd.f32 %v1005_v16, %v981_v13  ;;  %v860_v20 = vpop.xlane.xlu0 %859  ;;  %v864_v22 = vpop.xlane.xlu1 %863 }
 0x14e   :  { %v983_v21 = vsel %vm957_vm11, %v860_v20, 0.0  ;;  %v984_v25 = vsel %vm958_vm12, %v864_v22, 0.0  ;;  %vm1034_vm12 = vcmp.lt.s32.totalorder %v1593_v1, 13 }
 0x14f   :  { %v1007_v24 = vadd.f32 %v1006_v19, %v982_v17 }
 0x151   :  { %v1008_v27 = vadd.f32 %v1007_v24, %v983_v21  ;;  %v868_v28 = vpop.xlane.xlu0 %867  ;;  %v872_v30 = vpop.xlane.xlu1 %871 }
 0x152   :  { %v985_v29 = vsel %vm959_vm13, %v868_v28, 0.0  ;;  %v986_v33 = vsel %vm960_vm14, %v872_v30, 0.0  ;;  %vm1036_vm13 = vcmask 1040384  }
 0x153   :  { %v1009_v32 = vadd.f32 %v1008_v27, %v984_v25 }
 0x155   :  { %v1010_v35 = vadd.f32 %v1009_v32, %v985_v29  ;;  %v876_v36 = vpop.xlane.xlu0 %875  ;;  %v880_v38 = vpop.xlane.xlu1 %879 }
 0x156   :  { %v987_v37 = vsel %vm961_vm15, %v876_v36, 0.0  ;;  %v988_v41 = vsel %vm962_vm0, %v880_v38, 0.0 }
 0x157   :  { %v1011_v40 = vadd.f32 %v1010_v35, %v986_v33 }
 0x159   :  { %v1012_v43 = vadd.f32 %v1011_v40, %v987_v37  ;;  %v884_v44 = vpop.xlane.xlu0 %883  ;;  %v888_v46 = vpop.xlane.xlu1 %887 }
 0x15a   :  { %v989_v45 = vsel %vm963_vm1, %v884_v44, 0.0  ;;  %v990_v2 = vsel %vm964_vm2, %v888_v46, 0.0 }
 0x15b   :  { %v1013_v48 = vadd.f32 %v1012_v43, %v988_v41 }
 0x15d   :  { %v1014_v50 = vadd.f32 %v1013_v48, %v989_v45  ;;  %v892_v51 = vpop.xlane.xlu0 %891  ;;  %v896_v53 = vpop.xlane.xlu1 %895 }
 0x15e   :  { %v991_v52 = vsel %vm965_vm3, %v892_v51, 0.0  ;;  %v992_v56 = vsel %vm966_vm4, %v896_v53, 0.0 }
 0x15f   :  { %v1015_v55 = vadd.f32 %v1014_v50, %v990_v2 }
 0x161   :  { %v1016_v58 = vadd.f32 %v1015_v55, %v991_v52  ;;  %v900_v59 = vpop.xlane.xlu0 %899  ;;  %v904_v61 = vpop.xlane.xlu1 %903 }
 0x162   :  { %v993_v60 = vsel %vm967_vm5, %v900_v59, 0.0  ;;  %v994_v0 = vsel %vm968_vm6, %v904_v61, 0.0 }
 0x163   :  { %v1017_v63 = vadd.f32 %v1016_v58, %v992_v56 }
 0x165   :  { %v1018_v4 = vadd.f32 %v1017_v63, %v993_v60  ;;  %v908_v5 = vpop.xlane.xlu0 %907  ;;  %v912_v7 = vpop.xlane.xlu1 %911 }
 0x166   :  { %v995_v6 = vsel %vm969_vm7, %v908_v5, 0.0  ;;  %v996_v10 = vsel %vm970_vm8, %v912_v7, 0.0 }
 0x167   :  { %v1019_v9 = vadd.f32 %v1018_v4, %v994_v0 }
 0x169   :  { %v1020_v11 = vadd.f32 %v1019_v9, %v995_v6  ;;  %v916_v12 = vpop.xlane.xlu0 %915  ;;  %v920_v14 = vpop.xlane.xlu1 %919 }
 0x16a   :  { %v997_v13 = vsel %vm971_vm9, %v916_v12, 0.0  ;;  %v998_v16 = vsel %vm972_vm10, %v920_v14, 0.0 }
 0x16b   :  { %v1021_v15 = vadd.f32 %v1020_v11, %v996_v10 }
 0x16d   :  { %v1022_v17 = vadd.f32 %v1021_v15, %v997_v13 }
 0x16f   :  { %v1023_v18 = vadd.f32 %v1022_v17, %v998_v16 }
 0x171   :  { %v1024_v19 = vrot.slane %v1023_v18, 4 }
 0x173   :  { %v1025_v20 = vadd.f32 %v1024_v19, %v1023_v18 }
 0x175   :  { %v1026_v21 = vrot.slane %v1025_v20, 2 }
 0x177   :  { %v1027_v22 = vadd.f32 %v1026_v21, %v1025_v20 }
 0x179   :  { %v1028_v23 = vrot.slane %v1027_v22, 1 }
 0x17b   :  { %v1029_v24 = vadd.f32 %v1028_v23, %v1027_v22 }
 0x17d   :  { %v1030_v25 = vmul.f32 0.00020032052, %v1029_v24 }
 0x17f   :  { %vm1031_vm11 = vcmp.ne.f32.partialorder %v1030_v25, %v1030_v25  ;;  %v1032_v26 = vmin.f32 %v1030_v25, 50.0  ;;  %1048 = vst [vmem:[#allocation26] sm:$0x1] %v1030_v25 }
 0x181   :  { %v1033_v27 = vsel %vm1031_vm11, 0.0, %v1032_v26 }
 0x182   :  { %v1035_v28 = vsel %vm1034_vm12, %v1033_v27, 0.0 }
 0x183   :  { %v1037_v29 = vsel %vm1036_vm13, %v1035_v28, 0.0 }
 0x184   :  { %1038 = vadd.xlane.f32.xlu0 %v1037_v29 }
 0x20d   :  { %v1039_v30 = vpop.xlane.xlu0 %1038 }
 0x20e   :  { %v1040_v31 = vrot.slane %v1039_v30, 4 }
 0x210   :  { %v1041_v32 = vadd.f32 %v1040_v31, %v1039_v30 }
 0x212   :  { %v1042_v33 = vrot.slane %v1041_v32, 2 }
 0x214   :  { %v1043_v34 = vadd.f32 %v1042_v33, %v1041_v32 }
 0x216   :  { %v1044_v35 = vrot.slane %v1043_v34, 1 }
 0x218   :  { %v1045_v36 = vadd.f32 %v1044_v35, %v1043_v34 }
 0x21a   :  { %1073 = vpush %v1045_v36 }
 0x24b   :  { %s1074_s18 = spop %1073 }
 0x24c   :  { %v1049_v37 = vstv %s1074_s18 }
 0x24d   :  { %1050 = vst [vmem:[#allocation26 + $0x1] sm:$0x1] %v1049_v37 }
 0x24e   :  { %1388 = shalt.err (!%p1385_p4)
}
 0x24f   :  { %1060 = dma.vmem_to_hbm [thread:$0]  %s1058_s13, 128, %s1669_s14, [#allocation5]  }
 0x250   :  { %1413 = dma.done.wait [#allocation5], 128  }
 0x251   :  { %1414 = vsyncadd [#allocation5], 4294967168 }
 0x252   :  { %1064 = vsyncpa [#allocation4], 1 }
 0x253   :  { %1065 = vsyncpa [#allocation7], 1 }
 0x254   :  { %1066 = vsyncpa [#allocation10], 1 }
 0x255   :  { %1067 = vsyncpa [#allocation13], 1 }
 0x256   :  { %1068 = vsyncpa [#allocation16], 1 }
 0x257   :  { %1069 = vsyncpa [#allocation19], 1 }
 0x258   :  { %1070 = vsyncpa [#allocation22], 1 }
 0x259   :  { %1071 = vsyncpa [#allocation25], 1 }
 0x25a   :  { %1072 = vsyncpa [#allocation5], 1 }

</bundles_post_ra>
